<compile_context>
chip_gen: v7x
topology: tpu7x:2x2x1
jax: 0.10.0
libtpu: 0.0.40
codegen_flags: <defaults>
</compile_context>

<pallas_src>
import functools

import jax
import jax.numpy as jnp
from jax.experimental import pallas as pl
from jax.experimental.pallas import tpu as pltpu

LANE = 128      # TPU lane width
SUBTILE = 8     # f32 sublanes per vreg
ROW_ALIGN = 16  # keep row tiles legal for bf16 (16,128) min tile too


def _round_up(x, m):
    return (x + m - 1) // m * m


def _mdd_kernel(*refs, margin, weighted):
    """One grid step: fold a (tr, 128) tile of the MDD integrand into a single
    vreg-shaped (8, 128) partial sum (pure VPU adds, no XLU in steady state)."""
    if weighted:
        ys, ysadv, yt, ytadv, ws, wt, out_ref = refs
    else:
        ys, ysadv, yt, ytadv, out_ref = refs

    f32 = jnp.float32
    src = jnp.abs(ys[...].astype(f32) - ysadv[...].astype(f32)) * (-margin)
    tgt = jnp.abs(yt[...].astype(f32) - ytadv[...].astype(f32))
    if weighted:
        src = src * ws[...].astype(f32)
        tgt = tgt * wt[...].astype(f32)
    val = src + tgt                                   # (tr, 128) f32

    tr = val.shape[0]
    # Sublane-aligned split, then sum across vreg-tiles -> elementwise VPU adds.
    out_ref[...] = jnp.sum(val.reshape(tr // SUBTILE, SUBTILE, LANE), axis=0)


def margin_disparity_discrepancy(y_s, y_s_adv, y_t, y_t_adv,
                                 w_s=None, w_t=None,
                                 margin=4.0, reduction="mean",
                                 max_tile_rows=1024):
    """JAX/Pallas equivalent of MarginDisparityDiscrepancy.forward with
    element-wise L1 disparity on both domains."""
    assert y_s.shape == y_s_adv.shape == y_t.shape == y_t_adv.shape
    n_elem = int(y_s.size)

    if reduction == "mean":
        scale = 1.0 / float(n_elem)
    elif reduction == "sum":
        scale = 1.0
    else:
        # TODO(synk): reduction='none' (per-element output) not wired up here.
        raise NotImplementedError("only 'mean' and 'sum' reductions supported")

    weighted = (w_s is not None) or (w_t is not None)
    operands = [y_s, y_s_adv, y_t, y_t_adv]
    if weighted:
        # Only materialize a ones array for a *missing* weight when the other
        # one was actually supplied (unweighted fast path streams 4 tensors).
        if w_s is None:
            w_s = jnp.ones(y_s.shape, y_s.dtype)
        if w_t is None:
            w_t = jnp.ones(y_t.shape, y_t.dtype)
        if w_s.shape != y_s.shape:      # per-sample weights -> per-element
            w_s = jnp.broadcast_to(w_s.reshape(w_s.shape + (1,) * (y_s.ndim - w_s.ndim)), y_s.shape)
        if w_t.shape != y_t.shape:
            w_t = jnp.broadcast_to(w_t.reshape(w_t.shape + (1,) * (y_t.ndim - w_t.ndim)), y_t.shape)
        operands += [w_s, w_t]

    # Lane-dense layout: flatten, zero-pad to a whole number of (tr, 128) tiles.
    rows = pl.cdiv(n_elem, LANE)
    tr = max(ROW_ALIGN, min(int(max_tile_rows), _round_up(rows, ROW_ALIGN)))
    rows_padded = _round_up(rows, tr)
    num_tiles = rows_padded // tr

    def to_slab(x):
        flat = x.reshape(-1)
        pad = rows_padded * LANE - n_elem
        if pad:
            flat = jnp.pad(flat, (0, pad))   # zero padding contributes 0
        return flat.reshape(rows_padded, LANE)

    slabs = [to_slab(x) for x in operands]

    # VMEM budget: double-buffered inputs + double-buffered (8,128) output
    # block + headroom; stays far below v7x's 64 MiB physical VMEM.
    in_bytes = 2 * sum(jnp.dtype(s.dtype).itemsize for s in slabs) * tr * LANE
    out_bytes = 2 * SUBTILE * LANE * 4
    vmem_limit = min(max(int(in_bytes + out_bytes + (4 << 20)), 16 << 20), 48 << 20)

    kernel = functools.partial(_mdd_kernel, margin=float(margin),
                               weighted=weighted)
    in_spec = pl.BlockSpec((tr, LANE), lambda i: (i, 0))

    partials = pl.pallas_call(
        kernel,
        out_shape=jax.ShapeDtypeStruct((num_tiles * SUBTILE, LANE), jnp.float32),
        grid_spec=pltpu.PrefetchScalarGridSpec(
            num_scalar_prefetch=0,
            grid=(num_tiles,),
            in_specs=[in_spec] * len(slabs),
            out_specs=pl.BlockSpec((SUBTILE, LANE), lambda i: (i, 0)),
        ),
        compiler_params=pltpu.CompilerParams(
            dimension_semantics=("parallel",),   # no carried state -> megacore OK
            vmem_limit_bytes=vmem_limit,
        ),
    )(*slabs)

    # Tiny final reduction + reduction scale outside the kernel.
    return jnp.sum(partials) * scale


def _reference(y_s, y_s_adv, y_t, y_t_adv, w_s=None, w_t=None,
               margin=4.0, reduction="mean"):
    f32 = jnp.float32
    src = -margin * jnp.abs(y_s.astype(f32) - y_s_adv.astype(f32))
    tgt = jnp.abs(y_t.astype(f32) - y_t_adv.astype(f32))
    if w_s is not None:
        src = src * w_s.astype(f32)
    if w_t is not None:
        tgt = tgt * w_t.astype(f32)
    loss = src + tgt
    return jnp.mean(loss) if reduction == "mean" else jnp.sum(loss)


if __name__ == "__main__":
    key = jax.random.PRNGKey(0)

    # --- case 1: lane-aligned f32 logits, unweighted, mean -------------------
    B, C = 16, 128
    k1, k2, k3, k4, k5, k6 = jax.random.split(key, 6)
    y_s = jax.random.normal(k1, (B, C), jnp.float32)
    y_s_adv = jax.random.normal(k2, (B, C), jnp.float32)
    y_t = jax.random.normal(k3, (B, C), jnp.float32)
    y_t_adv = jax.random.normal(k4, (B, C), jnp.float32)

    out = margin_disparity_discrepancy(y_s, y_s_adv, y_t, y_t_adv,
                                       margin=4.0, reduction="mean")
    out = jax.block_until_ready(out)
    ref = _reference(y_s, y_s_adv, y_t, y_t_adv, margin=4.0, reduction="mean")
    assert jnp.allclose(out, ref, rtol=1e-5, atol=1e-5), (out, ref)

    # --- case 2: weighted, 'sum' reduction ------------------------------------
    w_s = jax.random.uniform(k5, (B, C), jnp.float32)
    w_t = jax.random.uniform(k6, (B, C), jnp.float32)
    out_w = jax.block_until_ready(
        margin_disparity_discrepancy(y_s, y_s_adv, y_t, y_t_adv, w_s, w_t,
                                     margin=4.0, reduction="sum"))
    ref_w = _reference(y_s, y_s_adv, y_t, y_t_adv, w_s, w_t,
                       margin=4.0, reduction="sum")
    assert jnp.allclose(out_w, ref_w, rtol=1e-4, atol=1e-4), (out_w, ref_w)

    # --- case 3: non-lane-aligned class count + bf16 inputs -------------------
    B2, C2 = 10, 31
    kk = jax.random.split(key, 4)
    mk = lambda k: jax.random.normal(k, (B2, C2), jnp.float32).astype(jnp.bfloat16)
    a, b, c, d = (mk(k) for k in kk)
    out_b = jax.block_until_ready(
        margin_disparity_discrepancy(a, b, c, d, margin=4.0, reduction="mean"))
    ref_b = _reference(a, b, c, d, margin=4.0, reduction="mean")
    assert jnp.allclose(out_b, ref_b, rtol=1e-5, atol=1e-5), (out_b, ref_b)

    print("KERNEL_OK")
</pallas_src>

<mosaic_0001>
module attributes {stable_mosaic.version = 11 : i64} {
  func.func @_mdd_kernel(%arg0: i32, %arg1: memref<16x128xf32, #tpu.memory_space<vmem>>, %arg2: memref<16x128xf32, #tpu.memory_space<vmem>>, %arg3: memref<16x128xf32, #tpu.memory_space<vmem>>, %arg4: memref<16x128xf32, #tpu.memory_space<vmem>>, %arg5: memref<8x128xf32, #tpu.memory_space<vmem>>) attributes {dimension_semantics = [#tpu.dimension_semantics<parallel>], iteration_bounds = array<i64: 1>, scalar_prefetch = 0 : i64, scratch_operands = 0 : i64, tpu.core_type = #tpu.core_type<tc>, window_params = [{transform_indices = @transform_0, window_bounds = array<i64: 16, 128>}, {transform_indices = @transform_1, window_bounds = array<i64: 16, 128>}, {transform_indices = @transform_2, window_bounds = array<i64: 16, 128>}, {transform_indices = @transform_3, window_bounds = array<i64: 16, 128>}, {transform_indices = @transform_4, window_bounds = array<i64: 8, 128>}]} {
    %c0 = arith.constant 0 : index
    %c0_0 = arith.constant 0 : index
    %0 = vector.load %arg1[%c0, %c0_0] : memref<16x128xf32, #tpu.memory_space<vmem>>, vector<16x128xf32>
    %c0_1 = arith.constant 0 : index
    %c0_2 = arith.constant 0 : index
    %1 = vector.load %arg2[%c0_1, %c0_2] : memref<16x128xf32, #tpu.memory_space<vmem>>, vector<16x128xf32>
    %2 = arith.subf %0, %1 : vector<16x128xf32>
    %3 = math.absf %2 : vector<16x128xf32>
    %cst = arith.constant -4.000000e+00 : f32
    %4 = vector.broadcast %cst : f32 to vector<16x128xf32>
    %5 = arith.mulf %3, %4 : vector<16x128xf32>
    %c0_3 = arith.constant 0 : index
    %c0_4 = arith.constant 0 : index
    %6 = vector.load %arg3[%c0_3, %c0_4] : memref<16x128xf32, #tpu.memory_space<vmem>>, vector<16x128xf32>
    %c0_5 = arith.constant 0 : index
    %c0_6 = arith.constant 0 : index
    %7 = vector.load %arg4[%c0_5, %c0_6] : memref<16x128xf32, #tpu.memory_space<vmem>>, vector<16x128xf32>
    %8 = arith.subf %6, %7 : vector<16x128xf32>
    %9 = math.absf %8 : vector<16x128xf32>
    %10 = arith.addf %5, %9 : vector<16x128xf32>
    %11 = vector.shape_cast %10 : vector<16x128xf32> to vector<2x8x128xf32>
    %cst_7 = arith.constant dense<0.000000e+00> : vector<8x128xf32>
    %12 = vector.multi_reduction <add>, %11, %cst_7 [0] : vector<2x8x128xf32> to vector<8x128xf32>
    %c0_8 = arith.constant 0 : index
    %c0_9 = arith.constant 0 : index
    %13 = vector.load %arg5[%c0_8, %c0_9] : memref<8x128xf32, #tpu.memory_space<vmem>>, vector<8x128xf32>
    tpu.vector_store %arg5[%c0_8, %c0_9], %12 {strides = array<i32>} : memref<8x128xf32, #tpu.memory_space<vmem>>, vector<8x128xf32>,
    return
  }
  func.func @transform_0(%arg0: i32) -> (i32, i32) {
    %c0_i32 = arith.constant 0 : i32
    %c0_i32_0 = arith.constant 0 : i32
    return %arg0, %c0_i32 : i32, i32
  }
  func.func @transform_1(%arg0: i32) -> (i32, i32) {
    %c0_i32 = arith.constant 0 : i32
    %c0_i32_0 = arith.constant 0 : i32
    return %arg0, %c0_i32 : i32, i32
  }
  func.func @transform_2(%arg0: i32) -> (i32, i32) {
    %c0_i32 = arith.constant 0 : i32
    %c0_i32_0 = arith.constant 0 : i32
    return %arg0, %c0_i32 : i32, i32
  }
  func.func @transform_3(%arg0: i32) -> (i32, i32) {
    %c0_i32 = arith.constant 0 : i32
    %c0_i32_0 = arith.constant 0 : i32
    return %arg0, %c0_i32 : i32, i32
  }
  func.func @transform_4(%arg0: i32) -> (i32, i32) {
    %c0_i32 = arith.constant 0 : i32
    %c0_i32_0 = arith.constant 0 : i32
    return %arg0, %c0_i32 : i32, i32
  }
}

</mosaic_0001>

<bundles_post_ra>
// kernel: tpu_custom_call.1
= control target key start
LH: loop header
LB: loop body
LE: loop exit
PB: predicated region body
PF: predicated region fallthrough
CT: control target
= control target key end

     0   :  { %9 = vsyncpa [#allocation3], 0  ;;  %s355_s0 = inlined_call_operand.hbm [shape: f32[16,128], index: 0, kind: input, shape index: {}]   ;;  %s356_s1 = inlined_call_operand.hbm [shape: f32[16,128], index: 1, kind: input, shape index: {}]   ;;  %s357_s2 = inlined_call_operand.hbm [shape: f32[16,128], index: 2, kind: input, shape index: {}]   ;;  %s358_s3 = inlined_call_operand.hbm [shape: f32[16,128], index: 3, kind: input, shape index: {}]   ;;  %s359_s4 = inlined_call_operand.hbm [shape: f32[8,128], index: 4, kind: output, shape index: {}]  }
   0x1   :  { %10 = vsyncpa [#allocation6], 0 }
   0x2   :  { %11 = vsyncpa [#allocation9], 0 }
   0x3   :  { %12 = vsyncpa [#allocation4], 0  ;;  %s237_s15 = smov [#allocation5]   ;;  %s238_s17 = smov [#allocation2]  }
   0x4   :  { %s30_s16 = sshll.u32 %s237_s15, 4  ;;  %s18_s18 = sshll.u32 %s238_s17, 4  ;;  %s31_s16 = int_to_ptr.vmem [resolvable:$true] %s30_s16  ;;  %s269_s18 = int_to_ptr.vmem [resolvable:$true] %s18_s18 }
   0x5   :  { %s119_s21 = scalar_lea.hbm %s356_s1, 256 }
   0x6   :  { %p120_p0 = scmp.ne.s32.totalorder %s356_s1, %s119_s21  ;;  %p123_p1 = scmp.lt.u32.totalorder %s119_s21, %s356_s1 }
   0x8   :  { %p125_p2 = pnand %p123_p1, %p120_p0 }
   0xa   :  { %128 = shalt.err (!%p125_p2)
}
   0xb   :  { %s129_s26 = scalar_lea.vmem %s31_s16, 256  ;;  %p134_p4 = scmp.lt.s32.totalorder %s31_s16, %s31_s16 }
   0xc   :  { %p130_p3 = scmp.ne.s32.totalorder %s31_s16, %s129_s26  ;;  %p135_p5 = scmp.lt.s32.totalorder %s129_s26, %s129_s26 }
   0xe   :  { %p136_p6 = por %p135_p5, %p134_p4 }
  0x10   :  { %p137_p7 = pnand %p136_p6, %p130_p3 }
  0x12   :  { %140 = shalt.err (!%p137_p7)
}
  0x13   :  { %s239_s27 = smov 128   ;;  %s240_s28 = smov 8  }
  0x14   :  { %36 = dma.hbm_to_vmem [thread:$0]  %s356_s1, 256, %s31_s16, [#allocation6], %s239_s27, %s239_s27, %s240_s28  }
  0x15   :  { %s141_s7 = scalar_lea.hbm %s355_s0, 256 }
  0x16   :  { %p142_p8 = scmp.ne.s32.totalorder %s355_s0, %s141_s7  ;;  %p145_p9 = scmp.lt.u32.totalorder %s141_s7, %s355_s0 }
  0x18   :  { %p147_p10 = pnand %p145_p9, %p142_p8 }
  0x1a   :  { %150 = shalt.err (!%p147_p10)
}
  0x1b   :  { %s151_s12 = scalar_lea.vmem %s269_s18, 256  ;;  %p156_p12 = scmp.lt.s32.totalorder %s269_s18, %s269_s18 }
  0x1c   :  { %p152_p11 = scmp.ne.s32.totalorder %s269_s18, %s151_s12  ;;  %p157_p13 = scmp.lt.s32.totalorder %s151_s12, %s151_s12 }
  0x1e   :  { %p158_p0 = por %p157_p13, %p156_p12 }
  0x20   :  { %p159_p1 = pnand %p158_p0, %p152_p11 }
  0x22   :  { %162 = shalt.err (!%p159_p1)
}
  0x23   :  { %24 = dma.hbm_to_vmem [thread:$0]  %s355_s0, 256, %s269_s18, [#allocation3], %s239_s27, %s239_s27, %s240_s28  }
  0x24   :  { %s241_s14 = smov [#allocation7]   ;;  %s242_s16 = smov [#allocation8]  }
  0x25   :  { %s42_s15 = sshll.u32 %s241_s14, 4  ;;  %s54_s17 = sshll.u32 %s242_s16, 4  ;;  %s43_s15 = int_to_ptr.vmem [resolvable:$true] %s42_s15  ;;  %s306_s17 = int_to_ptr.vmem [resolvable:$true] %s54_s17 }
  0x26   :  { %s163_s21 = scalar_lea.hbm %s357_s2, 256 }
  0x27   :  { %p164_p2 = scmp.ne.s32.totalorder %s357_s2, %s163_s21  ;;  %p167_p3 = scmp.lt.u32.totalorder %s163_s21, %s357_s2 }
  0x29   :  { %p169_p4 = pnand %p167_p3, %p164_p2 }
  0x2b   :  { %172 = shalt.err (!%p169_p4)
}
  0x2c   :  { %s173_s0 = scalar_lea.vmem %s43_s15, 256  ;;  %p178_p6 = scmp.lt.s32.totalorder %s43_s15, %s43_s15 }
  0x2d   :  { %p174_p5 = scmp.ne.s32.totalorder %s43_s15, %s173_s0  ;;  %p179_p7 = scmp.lt.s32.totalorder %s173_s0, %s173_s0 }
  0x2f   :  { %p180_p8 = por %p179_p7, %p178_p6 }
  0x31   :  { %p181_p9 = pnand %p180_p8, %p174_p5 }
  0x33   :  { %184 = shalt.err (!%p181_p9)
}
  0x34   :  { %48 = dma.hbm_to_vmem [thread:$0]  %s357_s2, 256, %s43_s15, [#allocation6], %s239_s27, %s239_s27, %s240_s28  }
  0x35   :  { %s185_s5 = scalar_lea.hbm %s358_s3, 256 }
  0x36   :  { %p186_p10 = scmp.ne.s32.totalorder %s358_s3, %s185_s5  ;;  %p189_p11 = scmp.lt.u32.totalorder %s185_s5, %s358_s3 }
  0x38   :  { %p191_p12 = pnand %p189_p11, %p186_p10 }
  0x3a   :  { %194 = shalt.err (!%p191_p12)
}
  0x3b   :  { %s195_s10 = scalar_lea.vmem %s306_s17, 256  ;;  %p200_p0 = scmp.lt.s32.totalorder %s306_s17, %s306_s17 }
  0x3c   :  { %p196_p13 = scmp.ne.s32.totalorder %s306_s17, %s195_s10  ;;  %p201_p1 = scmp.lt.s32.totalorder %s195_s10, %s195_s10 }
  0x3e   :  { %p202_p2 = por %p201_p1, %p200_p0 }
  0x40   :  { %p203_p3 = pnand %p202_p2, %p196_p13 }
  0x42   :  { %206 = shalt.err (!%p203_p3)
}
  0x43   :  { %60 = dma.hbm_to_vmem [thread:$0]  %s358_s3, 256, %s306_s17, [#allocation9], %s239_s27, %s239_s27, %s240_s28  }
  0x44   :  { %229 = dma.done.wait [#allocation3], 256  }
  0x45   :  { %230 = vsyncadd [#allocation3], 4294967040 }
  0x46   :  { %231 = dma.done.wait [#allocation6], 512  }
  0x47   :  { %232 = vsyncadd [#allocation6], 4294966784 }
  0x48   :  { %233 = dma.done.wait [#allocation9], 256  }
  0x49   :  { %234 = vsyncadd [#allocation9], 4294967040  ;;  %v73_v0 = vld [vmem:[#allocation2] sm:$0xff]  ;;  %v74_v1 = vld [vmem:[#allocation2 + $0x8] sm:$0xff]  ;;  %s243_s3 = smov [#allocation10]  }
  0x4a   :  { %v75_v2 = vld [vmem:[#allocation5] sm:$0xff]  ;;  %v76_v3 = vld [vmem:[#allocation5 + $0x8] sm:$0xff]  ;;  %v83_v5 = vld [vmem:[#allocation7] sm:$0xff]  ;;  %s101_s27 = sshll.u32 %s243_s3, 4  ;;  %s102_s27 = int_to_ptr.vmem [resolvable:$true] %s101_s27 }
  0x4b   :  { %v77_v4 = vsub.f32 %v73_v0, %v75_v2  ;;  %v84_v6 = vld [vmem:[#allocation7 + $0x8] sm:$0xff]  ;;  %v78_v7 = vsub.f32 %v74_v1, %v76_v3  ;;  %v85_v8 = vld [vmem:[#allocation8] sm:$0xff]  ;;  %v86_v9 = vld [vmem:[#allocation8 + $0x8] sm:$0xff]  ;;  %s207_s28 = scalar_lea.vmem %s102_s27, 128  ;;  %p212_p5 = scmp.lt.s32.totalorder %s102_s27, %s102_s27 }
  0x4c   :  { %v87_v11 = vsub.f32 %v83_v5, %v85_v8  ;;  %v88_v12 = vsub.f32 %v84_v6, %v86_v9  ;;  %p208_p4 = scmp.ne.s32.totalorder %s102_s27, %s207_s28  ;;  %p213_p6 = scmp.lt.s32.totalorder %s207_s28, %s207_s28 }
  0x4d   :  { %v79_v10 = vand.u32 2147483647, %v77_v4  ;;  %v80_v13 = vand.u32 2147483647, %v78_v7 }
  0x4e   :  { %v89_v15 = vand.u32 2147483647, %v87_v11  ;;  %v90_v16 = vand.u32 2147483647, %v88_v12  ;;  %p214_p7 = por %p213_p6, %p212_p5 }
  0x4f   :  { %v81_v14 = vmul.f32 -4.0, %v79_v10  ;;  %v82_v17 = vmul.f32 -4.0, %v80_v13 }
  0x50   :  { %p215_p8 = pnand %p214_p7, %p208_p4 }
  0x51   :  { %v91_v18 = vadd.f32 %v89_v15, %v81_v14  ;;  %v92_v19 = vadd.f32 %v90_v16, %v82_v17 }
  0x53   :  { %v93_v20 = vadd.f32 %v92_v19, %v91_v18 }
  0x55   :  { %94 = vst [vmem:[#allocation10] sm:$0xff] %v93_v20 }
  0x56   :  { %218 = shalt.err (!%p215_p8)
}
  0x57   :  { %s219_s13 = scalar_lea.hbm %s359_s4, 128 }
  0x58   :  { %p220_p9 = scmp.ne.s32.totalorder %s359_s4, %s219_s13  ;;  %p223_p10 = scmp.lt.u32.totalorder %s219_s13, %s359_s4 }
  0x5a   :  { %p225_p11 = pnand %p223_p10, %p220_p9 }
  0x5c   :  { %228 = shalt.err (!%p225_p11)
}
  0x5d   :  { %104 = dma.vmem_to_hbm [thread:$0]  %s102_s27, 128, %s359_s4, [#allocation4]  }
  0x5e   :  { %235 = dma.done.wait [#allocation4], 128  }
  0x5f   :  { %236 = vsyncadd [#allocation4], 4294967168 }
  0x60   :  { %108 = vsyncpa [#allocation3], 1 }
  0x61   :  { %109 = vsyncpa [#allocation6], 1 }
  0x62   :  { %110 = vsyncpa [#allocation9], 1 }
  0x63   :  { %111 = vsyncpa [#allocation4], 1 }

</bundles_post_ra>
